<compile_context>
chip_gen: v5e
topology: v5e:2x2
jax: 0.10.0
libtpu: 0.0.40
codegen_flags: <defaults>
</compile_context>

<pallas_src>
import jax
import jax.numpy as jnp
import numpy as np
from jax.experimental import pallas as pl
from jax.experimental.pallas import tpu as pltpu

POOL_K = 3  # MaxPool1d kernel size (== stride)


def encoder_kernel(x_ref, wconv_ref, bias_ref, w1t_ref, o_ref):
    """Fused conv (as shifted matmuls) + folded-BN + ReLU + maxpool + linear + ReLU.

    x_ref    : (P, TB, C)   position-major input; slab p holds x[:, :, p] (batch x channel)
    wconv_ref: (K, C, H)    conv weight per tap, pre-scaled by BN gamma/sqrt(var+eps)
    bias_ref : (2, H)       row 0: fused conv+BN bias, row 1: linear bias
    w1t_ref  : (H, H)       linear weight transposed (in, out)
    o_ref    : (TB, H)
    """
    K = wconv_ref.shape[0]
    P = x_ref.shape[0]
    conv_bias = bias_ref[0:1, :]

    pooled = None
    for t in range(POOL_K):              # the 3 conv outputs the single pool window consumes
        acc = None
        for kk in range(K):
            p = t + kk - 1               # conv padding=1: positions -1 / >= L are zeros
            if p < 0 or p >= P:
                continue                 # zero-pad taps contribute nothing -> skip matmul
            d = jnp.dot(x_ref[p], wconv_ref[kk], preferred_element_type=jnp.float32)
            acc = d if acc is None else acc + d
        yt = jnp.maximum(acc + conv_bias, 0.0)                        # conv + BN + ReLU
        pooled = yt if pooled is None else jnp.maximum(pooled, yt)    # MaxPool1d(3, 3)

    # Dropout = identity (eval); flatten is a no-op since pooled length == 1.
    z = jnp.dot(pooled, w1t_ref[...], preferred_element_type=jnp.float32) + bias_ref[1:2, :]
    o_ref[...] = jnp.maximum(z, 0.0)


def encoder_forward(x, params):
    """x: (B, C, L) float32, NCL layout (like PyTorch Conv1d)."""
    w_conv, b_conv, gamma, beta, rmean, rvar, w1, b1 = params
    B, C, L = x.shape
    H, _, K = w_conv.shape
    eps = 1e-5

    # MaxPool1d(3, 3) output length must be 1 for Linear(H, H) after flatten.
    L_pool = (L - POOL_K) // POOL_K + 1
    assert L_pool == 1, "Encoder.forward requires flattened size == hidden_dim (L in [3, 5])"

    # Only padded positions 0 .. POOL_K + K - 2 feed the single pool window; position 0 is
    # the left zero pad (handled in-kernel by skipping that tap), so only x[:, :, :P_in]
    # is ever touched.
    P_in = min(L, POOL_K + K - 2)
    x_in = jnp.transpose(x[:, :, :P_in], (2, 0, 1))          # (P_in, B, C)

    # Batch tile: multiple of 8 sublanes, capped; pad batch so the grid tiles evenly.
    TB = min(256, -(-B // 8) * 8)
    B_pad = -(-B // TB) * TB
    if B_pad != B:
        x_in = jnp.pad(x_in, ((0, 0), (0, B_pad - B), (0, 0)))

    # Fold BatchNorm (running stats) and the conv bias into the conv weights / one bias.
    bn_scale = gamma / jnp.sqrt(rvar + eps)
    w_fused = jnp.transpose(w_conv, (2, 1, 0)) * bn_scale[None, None, :]   # (K, C, H)
    bias_fused = (b_conv - rmean) * bn_scale + beta
    bias_packed = jnp.stack([bias_fused, b1], axis=0)                      # (2, H)
    w1t = w1.T                                                             # (H, H)

    grid = (B_pad // TB,)
    out = pl.pallas_call(
        encoder_kernel,
        out_shape=jax.ShapeDtypeStruct((B_pad, H), jnp.float32),
        grid=grid,
        in_specs=[
            pl.BlockSpec((P_in, TB, C), lambda i: (0, i, 0)),
            pl.BlockSpec((K, C, H), lambda i: (0, 0, 0)),
            pl.BlockSpec((2, H), lambda i: (0, 0)),
            pl.BlockSpec((H, H), lambda i: (0, 0)),
        ],
        out_specs=pl.BlockSpec((TB, H), lambda i: (i, 0)),
        compiler_params=pltpu.CompilerParams(dimension_semantics=("parallel",)),
    )(x_in, w_fused, bias_packed, w1t)
    return out[:B]


def reference_forward(x, params):
    """Pure-JAX reference mirroring the PyTorch forward (eval mode)."""
    w_conv, b_conv, gamma, beta, rmean, rvar, w1, b1 = params
    eps = 1e-5
    y = jax.lax.conv_general_dilated(
        x, w_conv, window_strides=(1,), padding=((1, 1),),
        dimension_numbers=('NCH', 'OIH', 'NCH'))
    y = y + b_conv[None, :, None]
    y = gamma[None, :, None] * (y - rmean[None, :, None]) / \
        jnp.sqrt(rvar[None, :, None] + eps) + beta[None, :, None]
    y = jnp.maximum(y, 0.0)
    pooled = jnp.max(y[:, :, :POOL_K], axis=2)                  # MaxPool1d(3, 3) -> len 1
    z = pooled @ w1.T + b1                                      # flatten is a no-op (len 1)
    return jnp.maximum(z, 0.0)


if __name__ == "__main__":
    B, C, L = 2, 4, 5            # batch, num_channels, sequence length
    H, K = 32, 3                 # hidden_dim, kernel_size

    key = jax.random.PRNGKey(0)
    ks = jax.random.split(key, 9)
    x = jax.random.normal(ks[0], (B, C, L), dtype=jnp.float32)

    # Deterministic synthetic parameters (PyTorch-like scales).
    w_conv = jax.random.uniform(ks[1], (H, C, K), jnp.float32, -0.3, 0.3)
    b_conv = jax.random.uniform(ks[2], (H,), jnp.float32, -0.3, 0.3)
    gamma  = jax.random.uniform(ks[3], (H,), jnp.float32, 0.5, 1.5)
    beta   = jax.random.uniform(ks[4], (H,), jnp.float32, -0.5, 0.5)
    rmean  = jax.random.uniform(ks[5], (H,), jnp.float32, -0.5, 0.5)
    rvar   = jax.random.uniform(ks[6], (H,), jnp.float32, 0.5, 1.5)
    w1     = jax.random.uniform(ks[7], (H, H), jnp.float32, -0.2, 0.2)
    b1     = jax.random.uniform(ks[8], (H,), jnp.float32, -0.2, 0.2)
    params = (w_conv, b_conv, gamma, beta, rmean, rvar, w1, b1)

    out = encoder_forward(x, params)
    out = jax.block_until_ready(out)

    ref = jax.block_until_ready(reference_forward(x, params))
    np.testing.assert_allclose(np.asarray(out), np.asarray(ref), rtol=2e-2, atol=2e-2)

    print("KERNEL_OK")
</pallas_src>

<mosaic_0001>
module attributes {stable_mosaic.version = 11 : i64} {
  func.func @encoder_kernel(%arg0: i32, %arg1: memref<4x8x4xf32, #tpu.memory_space<vmem>>, %arg2: memref<3x4x32xf32, #tpu.memory_space<vmem>>, %arg3: memref<2x32xf32, #tpu.memory_space<vmem>>, %arg4: memref<32x32xf32, #tpu.memory_space<vmem>>, %arg5: memref<8x32xf32, #tpu.memory_space<vmem>>) attributes {dimension_semantics = [#tpu.dimension_semantics<parallel>], iteration_bounds = array<i64: 1>, scalar_prefetch = 0 : i64, scratch_operands = 0 : i64, tpu.core_type = #tpu.core_type<tc>, window_params = [{transform_indices = @transform_0, window_bounds = array<i64: 4, 8, 4>}, {pipeline_mode = #tpu.pipeline_mode<synchronous>, transform_indices = @transform_1, window_bounds = array<i64: 3, 4, 32>}, {pipeline_mode = #tpu.pipeline_mode<synchronous>, transform_indices = @transform_2, window_bounds = array<i64: 2, 32>}, {pipeline_mode = #tpu.pipeline_mode<synchronous>, transform_indices = @transform_3, window_bounds = array<i64: 32, 32>}, {transform_indices = @transform_4, window_bounds = array<i64: 8, 32>}]} {
    %c0 = arith.constant 0 : index
    %c0_0 = arith.constant 0 : index
    %0 = vector.load %arg3[%c0, %c0_0] : memref<2x32xf32, #tpu.memory_space<vmem>>, vector<1x32xf32>
    %c0_1 = arith.constant 0 : index
    %c0_2 = arith.constant 0 : index
    %c0_3 = arith.constant 0 : index
    %1 = vector.load %arg1[%c0_1, %c0_2, %c0_3] : memref<4x8x4xf32, #tpu.memory_space<vmem>>, vector<1x8x4xf32>
    %2 = vector.shape_cast %1 : vector<1x8x4xf32> to vector<8x4xf32>
    %c1 = arith.constant 1 : index
    %c0_4 = arith.constant 0 : index
    %c0_5 = arith.constant 0 : index
    %3 = vector.load %arg2[%c1, %c0_4, %c0_5] : memref<3x4x32xf32, #tpu.memory_space<vmem>>, vector<1x4x32xf32>
    %4 = vector.shape_cast %3 : vector<1x4x32xf32> to vector<4x32xf32>
    %cst = arith.constant dense<0.000000e+00> : vector<8x32xf32>
    %5 = tpu.matmul %2, %4, %cst {dimension_numbers = #tpu.dot_dimension_numbers<[1], [0], [0], [1], [0, 0, 1, 1], [], []>} : vector<8x4xf32>, vector<4x32xf32>, vector<8x32xf32> -> vector<8x32xf32>
    %c1_6 = arith.constant 1 : index
    %c0_7 = arith.constant 0 : index
    %c0_8 = arith.constant 0 : index
    %6 = vector.load %arg1[%c1_6, %c0_7, %c0_8] : memref<4x8x4xf32, #tpu.memory_space<vmem>>, vector<1x8x4xf32>
    %7 = vector.shape_cast %6 : vector<1x8x4xf32> to vector<8x4xf32>
    %c2 = arith.constant 2 : index
    %c0_9 = arith.constant 0 : index
    %c0_10 = arith.constant 0 : index
    %8 = vector.load %arg2[%c2, %c0_9, %c0_10] : memref<3x4x32xf32, #tpu.memory_space<vmem>>, vector<1x4x32xf32>
    %9 = vector.shape_cast %8 : vector<1x4x32xf32> to vector<4x32xf32>
    %cst_11 = arith.constant dense<0.000000e+00> : vector<8x32xf32>
    %10 = tpu.matmul %7, %9, %cst_11 {dimension_numbers = #tpu.dot_dimension_numbers<[1], [0], [0], [1], [0, 0, 1, 1], [], []>} : vector<8x4xf32>, vector<4x32xf32>, vector<8x32xf32> -> vector<8x32xf32>
    %11 = arith.addf %5, %10 : vector<8x32xf32>
    %12 = vector.broadcast %0 : vector<1x32xf32> to vector<8x32xf32>
    %13 = arith.addf %11, %12 : vector<8x32xf32>
    %cst_12 = arith.constant 0.000000e+00 : f32
    %14 = vector.broadcast %cst_12 : f32 to vector<8x32xf32>
    %15 = arith.maximumf %13, %14 : vector<8x32xf32>
    %c0_13 = arith.constant 0 : index
    %c0_14 = arith.constant 0 : index
    %c0_15 = arith.constant 0 : index
    %16 = vector.load %arg1[%c0_13, %c0_14, %c0_15] : memref<4x8x4xf32, #tpu.memory_space<vmem>>, vector<1x8x4xf32>
    %17 = vector.shape_cast %16 : vector<1x8x4xf32> to vector<8x4xf32>
    %c0_16 = arith.constant 0 : index
    %c0_17 = arith.constant 0 : index
    %c0_18 = arith.constant 0 : index
    %18 = vector.load %arg2[%c0_16, %c0_17, %c0_18] : memref<3x4x32xf32, #tpu.memory_space<vmem>>, vector<1x4x32xf32>
    %19 = vector.shape_cast %18 : vector<1x4x32xf32> to vector<4x32xf32>
    %cst_19 = arith.constant dense<0.000000e+00> : vector<8x32xf32>
    %20 = tpu.matmul %17, %19, %cst_19 {dimension_numbers = #tpu.dot_dimension_numbers<[1], [0], [0], [1], [0, 0, 1, 1], [], []>} : vector<8x4xf32>, vector<4x32xf32>, vector<8x32xf32> -> vector<8x32xf32>
    %c1_20 = arith.constant 1 : index
    %c0_21 = arith.constant 0 : index
    %c0_22 = arith.constant 0 : index
    %21 = vector.load %arg1[%c1_20, %c0_21, %c0_22] : memref<4x8x4xf32, #tpu.memory_space<vmem>>, vector<1x8x4xf32>
    %22 = vector.shape_cast %21 : vector<1x8x4xf32> to vector<8x4xf32>
    %c1_23 = arith.constant 1 : index
    %c0_24 = arith.constant 0 : index
    %c0_25 = arith.constant 0 : index
    %23 = vector.load %arg2[%c1_23, %c0_24, %c0_25] : memref<3x4x32xf32, #tpu.memory_space<vmem>>, vector<1x4x32xf32>
    %24 = vector.shape_cast %23 : vector<1x4x32xf32> to vector<4x32xf32>
    %cst_26 = arith.constant dense<0.000000e+00> : vector<8x32xf32>
    %25 = tpu.matmul %22, %24, %cst_26 {dimension_numbers = #tpu.dot_dimension_numbers<[1], [0], [0], [1], [0, 0, 1, 1], [], []>} : vector<8x4xf32>, vector<4x32xf32>, vector<8x32xf32> -> vector<8x32xf32>
    %26 = arith.addf %20, %25 : vector<8x32xf32>
    %c2_27 = arith.constant 2 : index
    %c0_28 = arith.constant 0 : index
    %c0_29 = arith.constant 0 : index
    %27 = vector.load %arg1[%c2_27, %c0_28, %c0_29] : memref<4x8x4xf32, #tpu.memory_space<vmem>>, vector<1x8x4xf32>
    %28 = vector.shape_cast %27 : vector<1x8x4xf32> to vector<8x4xf32>
    %c2_30 = arith.constant 2 : index
    %c0_31 = arith.constant 0 : index
    %c0_32 = arith.constant 0 : index
    %29 = vector.load %arg2[%c2_30, %c0_31, %c0_32] : memref<3x4x32xf32, #tpu.memory_space<vmem>>, vector<1x4x32xf32>
    %30 = vector.shape_cast %29 : vector<1x4x32xf32> to vector<4x32xf32>
    %cst_33 = arith.constant dense<0.000000e+00> : vector<8x32xf32>
    %31 = tpu.matmul %28, %30, %cst_33 {dimension_numbers = #tpu.dot_dimension_numbers<[1], [0], [0], [1], [0, 0, 1, 1], [], []>} : vector<8x4xf32>, vector<4x32xf32>, vector<8x32xf32> -> vector<8x32xf32>
    %32 = arith.addf %26, %31 : vector<8x32xf32>
    %33 = vector.broadcast %0 : vector<1x32xf32> to vector<8x32xf32>
    %34 = arith.addf %32, %33 : vector<8x32xf32>
    %cst_34 = arith.constant 0.000000e+00 : f32
    %35 = vector.broadcast %cst_34 : f32 to vector<8x32xf32>
    %36 = arith.maximumf %34, %35 : vector<8x32xf32>
    %37 = arith.maximumf %15, %36 : vector<8x32xf32>
    %c1_35 = arith.constant 1 : index
    %c0_36 = arith.constant 0 : index
    %c0_37 = arith.constant 0 : index
    %38 = vector.load %arg1[%c1_35, %c0_36, %c0_37] : memref<4x8x4xf32, #tpu.memory_space<vmem>>, vector<1x8x4xf32>
    %39 = vector.shape_cast %38 : vector<1x8x4xf32> to vector<8x4xf32>
    %c0_38 = arith.constant 0 : index
    %c0_39 = arith.constant 0 : index
    %c0_40 = arith.constant 0 : index
    %40 = vector.load %arg2[%c0_38, %c0_39, %c0_40] : memref<3x4x32xf32, #tpu.memory_space<vmem>>, vector<1x4x32xf32>
    %41 = vector.shape_cast %40 : vector<1x4x32xf32> to vector<4x32xf32>
    %cst_41 = arith.constant dense<0.000000e+00> : vector<8x32xf32>
    %42 = tpu.matmul %39, %41, %cst_41 {dimension_numbers = #tpu.dot_dimension_numbers<[1], [0], [0], [1], [0, 0, 1, 1], [], []>} : vector<8x4xf32>, vector<4x32xf32>, vector<8x32xf32> -> vector<8x32xf32>
    %c2_42 = arith.constant 2 : index
    %c0_43 = arith.constant 0 : index
    %c0_44 = arith.constant 0 : index
    %43 = vector.load %arg1[%c2_42, %c0_43, %c0_44] : memref<4x8x4xf32, #tpu.memory_space<vmem>>, vector<1x8x4xf32>
    %44 = vector.shape_cast %43 : vector<1x8x4xf32> to vector<8x4xf32>
    %c1_45 = arith.constant 1 : index
    %c0_46 = arith.constant 0 : index
    %c0_47 = arith.constant 0 : index
    %45 = vector.load %arg2[%c1_45, %c0_46, %c0_47] : memref<3x4x32xf32, #tpu.memory_space<vmem>>, vector<1x4x32xf32>
    %46 = vector.shape_cast %45 : vector<1x4x32xf32> to vector<4x32xf32>
    %cst_48 = arith.constant dense<0.000000e+00> : vector<8x32xf32>
    %47 = tpu.matmul %44, %46, %cst_48 {dimension_numbers = #tpu.dot_dimension_numbers<[1], [0], [0], [1], [0, 0, 1, 1], [], []>} : vector<8x4xf32>, vector<4x32xf32>, vector<8x32xf32> -> vector<8x32xf32>
    %48 = arith.addf %42, %47 : vector<8x32xf32>
    %c3 = arith.constant 3 : index
    %c0_49 = arith.constant 0 : index
    %c0_50 = arith.constant 0 : index
    %49 = vector.load %arg1[%c3, %c0_49, %c0_50] : memref<4x8x4xf32, #tpu.memory_space<vmem>>, vector<1x8x4xf32>
    %50 = vector.shape_cast %49 : vector<1x8x4xf32> to vector<8x4xf32>
    %c2_51 = arith.constant 2 : index
    %c0_52 = arith.constant 0 : index
    %c0_53 = arith.constant 0 : index
    %51 = vector.load %arg2[%c2_51, %c0_52, %c0_53] : memref<3x4x32xf32, #tpu.memory_space<vmem>>, vector<1x4x32xf32>
    %52 = vector.shape_cast %51 : vector<1x4x32xf32> to vector<4x32xf32>
    %cst_54 = arith.constant dense<0.000000e+00> : vector<8x32xf32>
    %53 = tpu.matmul %50, %52, %cst_54 {dimension_numbers = #tpu.dot_dimension_numbers<[1], [0], [0], [1], [0, 0, 1, 1], [], []>} : vector<8x4xf32>, vector<4x32xf32>, vector<8x32xf32> -> vector<8x32xf32>
    %54 = arith.addf %48, %53 : vector<8x32xf32>
    %55 = vector.broadcast %0 : vector<1x32xf32> to vector<8x32xf32>
    %56 = arith.addf %54, %55 : vector<8x32xf32>
    %cst_55 = arith.constant 0.000000e+00 : f32
    %57 = vector.broadcast %cst_55 : f32 to vector<8x32xf32>
    %58 = arith.maximumf %56, %57 : vector<8x32xf32>
    %59 = arith.maximumf %37, %58 : vector<8x32xf32>
    %c0_56 = arith.constant 0 : index
    %c0_57 = arith.constant 0 : index
    %60 = vector.load %arg4[%c0_56, %c0_57] : memref<32x32xf32, #tpu.memory_space<vmem>>, vector<32x32xf32>
    %cst_58 = arith.constant dense<0.000000e+00> : vector<8x32xf32>
    %61 = tpu.matmul %59, %60, %cst_58 {dimension_numbers = #tpu.dot_dimension_numbers<[1], [0], [0], [1], [0, 0, 1, 1], [], []>} : vector<8x32xf32>, vector<32x32xf32>, vector<8x32xf32> -> vector<8x32xf32>
    %c1_59 = arith.constant 1 : index
    %c0_60 = arith.constant 0 : index
    %62 = vector.load %arg3[%c1_59, %c0_60] : memref<2x32xf32, #tpu.memory_space<vmem>>, vector<1x32xf32>
    %63 = vector.broadcast %62 : vector<1x32xf32> to vector<8x32xf32>
    %64 = arith.addf %61, %63 : vector<8x32xf32>
    %cst_61 = arith.constant 0.000000e+00 : f32
    %65 = vector.broadcast %cst_61 : f32 to vector<8x32xf32>
    %66 = arith.maximumf %64, %65 : vector<8x32xf32>
    %c0_62 = arith.constant 0 : index
    %c0_63 = arith.constant 0 : index
    %67 = vector.load %arg5[%c0_62, %c0_63] : memref<8x32xf32, #tpu.memory_space<vmem>>, vector<8x32xf32>
    tpu.vector_store %arg5[%c0_62, %c0_63], %66 {strides = array<i32>} : memref<8x32xf32, #tpu.memory_space<vmem>>, vector<8x32xf32>,
    return
  }
  func.func @transform_0(%arg0: i32) -> (i32, i32, i32) {
    %c0_i32 = arith.constant 0 : i32
    %c0_i32_0 = arith.constant 0 : i32
    %c0_i32_1 = arith.constant 0 : i32
    return %c0_i32, %arg0, %c0_i32_0 : i32, i32, i32
  }
  func.func @transform_1(%arg0: i32) -> (i32, i32, i32) {
    %c0_i32 = arith.constant 0 : i32
    %c0_i32_0 = arith.constant 0 : i32
    %c0_i32_1 = arith.constant 0 : i32
    %c0_i32_2 = arith.constant 0 : i32
    return %c0_i32, %c0_i32_0, %c0_i32_1 : i32, i32, i32
  }
  func.func @transform_2(%arg0: i32) -> (i32, i32) {
    %c0_i32 = arith.constant 0 : i32
    %c0_i32_0 = arith.constant 0 : i32
    %c0_i32_1 = arith.constant 0 : i32
    return %c0_i32, %c0_i32_0 : i32, i32
  }
  func.func @transform_3(%arg0: i32) -> (i32, i32) {
    %c0_i32 = arith.constant 0 : i32
    %c0_i32_0 = arith.constant 0 : i32
    %c0_i32_1 = arith.constant 0 : i32
    return %c0_i32, %c0_i32_0 : i32, i32
  }
  func.func @transform_4(%arg0: i32) -> (i32, i32) {
    %c0_i32 = arith.constant 0 : i32
    %c0_i32_0 = arith.constant 0 : i32
    return %arg0, %c0_i32 : i32, i32
  }
}

</mosaic_0001>

<bundles_post_ra>
// kernel: tpu_custom_call.1
= control target key start
LH: loop header
LB: loop body
LE: loop exit
PB: predicated region body
PF: predicated region fallthrough
CT: control target
= control target key end

     0   :  { %vm30_vm0 = vcmask 1043456   ;;  %vm26_vm1 = vcmask 31744   ;;  %s408_s0 = inlined_call_operand.vmem [shape: f32[4,8,4], index: 0, kind: input, shape index: {}]   ;;  %s409_s1 = inlined_call_operand.vmem [shape: f32[3,4,32], index: 1, kind: input, shape index: {}]   ;;  %s410_s2 = inlined_call_operand.vmem [shape: f32[2,32], index: 2, kind: input, shape index: {}]   ;;  %s411_s3 = inlined_call_operand.vmem [shape: f32[32,32], index: 3, kind: input, shape index: {}]   ;;  %s412_s4 = inlined_call_operand.hbm [shape: f32[8,32], index: 4, kind: output, shape index: {}]  }
   0x1   :  { %v275_v0 = vld [vmem:[%s409_s1 + $0x8] sm:$0xf]  ;;  %v273_v1 = vld [vmem:[%s409_s1 + $0x4] sm:$0xf]  ;;  %v83_v3 = vld [vmem:[%s409_s1] sm:$0xf] }
   0x2   :  { %v274_v2 = vld [vmem:[%s408_s0 + $0x8] sm:$0xff]  ;;  %276 = vmatpush.msk.msra.mxu0 %vm30_vm0, %v275_v0  ;;  %280 = vmatpush.msk.msra.mxu2 %vm30_vm0, %v273_v1  ;;  %v19_v4 = vld [vmem:[%s408_s0] sm:$0xff] }
   0x3   :  { %282 = vmatpush.msk.msra.mxu3 %vm30_vm0, %v83_v3  ;;  %277 = vmatmul.msk.f32.vlgmr.msra.gmra.mxu0 %vm26_vm1, %v274_v2 }
   0x4   :  { %281 = vmatmul.msk.f32.vlgmr.msra.gmra.mxu2 %vm26_vm1, %v274_v2  ;;  %283 = vmatmul.msk.f32.vlgmr.msra.gmra.mxu3 %vm26_vm1, %v19_v4 }
   0x5   :  { %9 = vsyncpa [#allocation3], 0  ;;  %289 = vmatpush.msk.msrb.mxu2 %vm30_vm0, %v83_v3  ;;  %292 = vmatpush.msk.msrb.mxu3 %vm30_vm0, %v275_v0  ;;  %v284_v5 = vld [vmem:[%s408_s0 + $0x10] sm:$0xff]  ;;  %v291_v6 = vld [vmem:[%s408_s0 + $0x18] sm:$0xff]  ;;  %vm231_vm2 = vcmask 261120   ;;  %s324_s12 = smov [#allocation2]  }
   0x6   :  { %278 = vmatpush.msk.msra.mxu1 %vm30_vm0, %v273_v1  ;;  %285 = vmatpush.msk.msrb.mxu0 %vm30_vm0, %v275_v0  ;;  %v228_v7 = vld [vmem:[%s411_s3 + $0x18] sm:$0xff]  ;;  %v227_v8 = vld [vmem:[%s411_s3 + $0x10] sm:$0xff]  ;;  %v226_v9 = vld [vmem:[%s411_s3 + $0x8] sm:$0xff]  ;;  %s262_s13 = sshll.u32 %s324_s12, 4  ;;  %s264_s16 = sshll.u32 %s412_s4, 4  ;;  %s263_s13 = int_to_ptr.vmem [resolvable:$true] %s262_s13  ;;  %s265_s16 = int_to_ptr.hbm [resolvable:$true] %s264_s16 }
   0x7   :  { %279 = vmatmul.msk.f32.vlgmr.msra.gmra.mxu1 %vm26_vm1, %v19_v4  ;;  %v225_v10 = vld [vmem:[%s411_s3] sm:$0xff] }
   0x8   :  { %287 = vmatpush.msk.msrb.mxu1 %vm30_vm0, %v273_v1  ;;  %247 = vmatpush.msra.mxu0 %v228_v7  ;;  %v296_v19 = vld [vmem:[%s410_s2] ss:$0 sm:$0xff]  ;;  %v297_v33 = vld [vmem:[%s410_s2 + $0x1] ss:$0 sm:$0xff] }
   0xa   :  { %248 = vmatpush.msra.mxu0 %v227_v8 }
   0xb   :  { %286 = vmatmul.msk.f32.vlgmr.msrb.gmra.mxu0 %vm26_vm1, %v284_v5 }
   0xc   :  { %290 = vmatmul.msk.f32.vlgmr.msrb.gmra.mxu2 %vm26_vm1, %v274_v2  ;;  %293 = vmatmul.msk.f32.vlgmr.msrb.gmra.mxu3 %vm26_vm1, %v291_v6 }
   0xd   :  { %249 = vmatpush.msra.mxu0 %v226_v9 }
   0xf   :  { %288 = vmatmul.msk.f32.vlgmr.msrb.gmra.mxu1 %vm26_vm1, %v284_v5  ;;  %250 = vmatpush.msra.mxu0 %v225_v10 }
  0x80   :  { %v51_v11 = vpop.f32.mrf.mxu0 }
  0x84   :  { %v77_v12 = vpop.f32.mrf.mxu1 }
  0x85   :  { %v78_v18 = vadd.f32 %v77_v12, %v51_v11 }
  0x87   :  { %v101_v13 = vpop.f32.mrf.mxu2  ;;  %v124_v14 = vpop.f32.mrf.mxu3  ;;  %v81_v24 = vadd.f32 %v296_v19, %v78_v18 }
  0x88   :  { %v125_v15 = vadd.f32 %v124_v14, %v101_v13  ;;  %v149_v16 = vpop.f32.mrf.mxu0 }
  0x89   :  { %v82_v28 = vmax.f32 %v81_v24, 0.0 }
  0x8a   :  { %v152_v17 = vadd.f32 %v149_v16, %v125_v15 }
  0x8c   :  { %v173_v20 = vpop.f32.mrf.mxu1  ;;  %v153_v21 = vadd.f32 %v296_v19, %v152_v17 }
  0x8e   :  { %v154_v26 = vmax.f32 %v153_v21, 0.0 }
  0x8f   :  { %v193_v22 = vpop.f32.mrf.mxu2  ;;  %v218_v23 = vpop.f32.mrf.mxu3 }
  0x90   :  { %v194_v25 = vadd.f32 %v193_v22, %v173_v20  ;;  %v155_v30 = vmax.f32 %v82_v28, %v154_v26 }
  0x92   :  { %v221_v27 = vadd.f32 %v218_v23, %v194_v25 }
  0x94   :  { %v222_v29 = vadd.f32 %v296_v19, %v221_v27 }
  0x96   :  { %v223_v31 = vmax.f32 %v222_v29, 0.0 }
  0x98   :  { %v224_v32 = vmax.f32 %v155_v30, %v223_v31 }
  0x9a   :  { %294 = vmatmul.msk.f32.vlgmr.msra.gmra.mxu0 %vm231_vm2, %v224_v32 }
 0x117   :  { %v252_v34 = vpop.f32.mrf.mxu0 }
 0x118   :  { %v253_v35 = vadd.f32 %v297_v33, %v252_v34 }
 0x11a   :  { %v255_v36 = vmax.f32 %v253_v35, 0.0 }
 0x11c   :  { %256 = vst.msk [vmem:[#allocation2] sm:$0xff] %vm231_vm2, %v255_v36 }
 0x11d   :  { %267 = dma.vmem_to_hbm [thread:$0]  %s263_s13, 128, %s265_s16, [#allocation3]  }
 0x11e   :  { %322 = dma.done.wait [#allocation3], 128  }
 0x11f   :  { %323 = vsyncadd [#allocation3], 4294967168 }
 0x120   :  { %272 = vsyncpa [#allocation3], 1 }

</bundles_post_ra>
